<compile_context>
chip_gen: v7x
topology: tpu7x:2x2x1
jax: 0.10.0
libtpu: 0.0.40
codegen_flags: <defaults>
</compile_context>

<pallas_src>
import jax
import jax.numpy as jnp
from jax.experimental import pallas as pl
from jax.experimental.pallas import tpu as pltpu


def _make_hypo_kernel(min_val, max_val, dtype):
    """Elementwise clamp kernel with compile-time constant, dtype-cast bounds."""

    def kernel(x_ref, o_ref):
        lo = jnp.asarray(min_val, dtype)
        hi = jnp.asarray(max_val, dtype)
        x = x_ref[...]
        # min(max(x, lo), hi) stays in the native dtype (bf16/int) - no f32
        # promotion from Python-float weak typing.
        o_ref[...] = jnp.minimum(jnp.maximum(x, lo), hi)

    return kernel


def _default_block_bytes():
    """Per-buffer block size: ~4 MiB generally, ~8 MiB on v7x (3.2 TB/s HBM
    makes per-step overhead relatively more expensive there)."""
    try:
        kind = jax.devices()[0].device_kind.lower()
    except Exception:  # pragma: no cover - defensive
        kind = ""
    if "v7" in kind:
        return 8 * 1024 * 1024
    return 4 * 1024 * 1024


def hypo(x, min_val=0.0, max_val=1.0, *,
         inplace=False,
         block_bytes=None,
         min_pallas_elems=1 << 14):
    """Pallas equivalent of torch.clamp(x, min=min_val, max=max_val)."""
    if min_val > max_val:
        # Mirrors the PyTorch module's constructor check (it exits on min > max).
        raise ValueError(
            f"Error: min({min_val}) is not supposed to be larger than max({max_val})!"
        )

    orig_shape = x.shape
    orig_dtype = x.dtype
    n = x.size

    LANES = 128
    # Small-input / awkward-size fast path: plain elementwise clamp (dtype-safe).
    if n < min_pallas_elems or n % LANES != 0:
        lo = jnp.asarray(min_val, orig_dtype)
        hi = jnp.asarray(max_val, orig_dtype)
        return jnp.minimum(jnp.maximum(x, lo), hi)

    if block_bytes is None:
        block_bytes = _default_block_bytes()

    # Pick the widest lane-dense last dim (multiple of 128) that divides n exactly,
    # so the reshape is pure metadata (no padding, no extra HBM pass).
    width = LANES
    for w in (4096, 2048, 1024, 512, 256):
        if n % w == 0:
            width = w
            break
    rows = n // width
    x2d = jnp.reshape(x, (rows, width))

    # Dtype-aware sublane multiple: 8 for 4-byte, 16 for 2-byte, 32 for 1-byte dtypes.
    itemsize = jnp.dtype(orig_dtype).itemsize
    sublane = {4: 8, 2: 16, 1: 32}.get(itemsize, 8)

    # Block rows: target ~block_bytes per buffer, rounded to the sublane multiple,
    # never larger than the (rounded-up) array.
    rows_by_bytes = max(sublane, (block_bytes // (width * itemsize)) // sublane * sublane)
    rows_rounded_up = ((rows + sublane - 1) // sublane) * sublane
    block_rows = min(rows_by_bytes, rows_rounded_up)

    # Megacore (v7x has 2 TCs): make sure there are >= 2 grid steps whenever
    # there is enough work, so the "parallel" axis can shard across both cores.
    if rows > sublane:
        half_rows = (((rows + 1) // 2) + sublane - 1) // sublane * sublane
        block_rows = min(block_rows, max(sublane, half_rows))

    # Partial last block: Pallas masks out-of-bounds writes; the overhang reads
    # are garbage that gets clamped and discarded. Correct even when rows is not
    # a multiple of block_rows / sublane.
    num_blocks = (rows + block_rows - 1) // block_rows

    blk_bytes_actual = block_rows * width * itemsize
    # 2 inputs-bufs + 2 output-bufs (double buffering) + headroom for compiler
    # scratch; cap at 48 MiB so we stay inside v7x's 64 MiB physical VMEM.
    vmem_limit = min(48 * 1024 * 1024, 4 * blk_bytes_actual + 16 * 1024 * 1024)

    cost = pl.CostEstimate(
        flops=n,                      # one compare-select pair per element, ~1 "flop"
        transcendentals=0,
        bytes_accessed=2 * n * itemsize,
    )

    out2d = pl.pallas_call(
        _make_hypo_kernel(min_val, max_val, orig_dtype),
        out_shape=jax.ShapeDtypeStruct((rows, width), orig_dtype),
        grid=(num_blocks,),
        in_specs=[pl.BlockSpec((block_rows, width), lambda i: (i, 0))],
        out_specs=pl.BlockSpec((block_rows, width), lambda i: (i, 0)),
        compiler_params=pltpu.CompilerParams(
            dimension_semantics=("parallel",),
            vmem_limit_bytes=vmem_limit,
        ),
        cost_estimate=cost,
        # Mirrors the module's inplace flag: output reuses the input HBM buffer
        # (XLA inserts a copy if the input cannot actually be donated).
        input_output_aliases=({0: 0} if inplace else {}),
    )(x2d)

    return jnp.reshape(out2d, orig_shape)


if __name__ == "__main__":
    key = jax.random.PRNGKey(0)
    k1, k2, k3, k4 = jax.random.split(key, 4)

    def _ref(x, lo=0.0, hi=1.0):
        lo = jnp.asarray(lo, x.dtype)
        hi = jnp.asarray(hi, x.dtype)
        return jnp.minimum(jnp.maximum(x, lo), hi)

    # 1) Small NCHW activation consistent with the module -> fast path.
    x_small = jax.random.normal(k1, (2, 4, 16, 16), dtype=jnp.float32) * 2.0
    out_small = jax.block_until_ready(hypo(x_small, min_val=0.0, max_val=1.0))
    assert out_small.shape == x_small.shape and out_small.dtype == x_small.dtype
    assert jnp.allclose(out_small, _ref(x_small)), "mismatch (small / fast path)"

    # 2) Kernel path, exact 2-block grid (feeds both v7x TensorCores).
    x_big = jax.random.normal(k2, (4, 8, 64, 64), dtype=jnp.float32) * 2.0
    out_big = jax.block_until_ready(hypo(x_big, min_val=0.0, max_val=1.0))
    assert out_big.shape == x_big.shape and out_big.dtype == x_big.dtype
    assert jnp.allclose(out_big, _ref(x_big)), "mismatch (kernel path)"

    # 3) Kernel path with a partial last grid block (rows not divisible by block_rows).
    x_part = jax.random.normal(k3, (5, 8, 64, 64), dtype=jnp.float32) * 2.0
    out_part = jax.block_until_ready(hypo(x_part, min_val=-0.5, max_val=0.5))
    assert out_part.shape == x_part.shape and out_part.dtype == x_part.dtype
    assert jnp.allclose(out_part, _ref(x_part, -0.5, 0.5)), "mismatch (partial block)"

    # 4) bf16 kernel path with inplace aliasing (dtype-cast bounds, no f32 promotion).
    x_bf16 = (jax.random.normal(k4, (4, 8, 64, 64), dtype=jnp.float32) * 2.0).astype(jnp.bfloat16)
    ref_bf16 = _ref(x_bf16)  # computed before the (possibly aliasing) kernel call
    out_bf16 = jax.block_until_ready(hypo(x_bf16, min_val=0.0, max_val=1.0, inplace=True))
    assert out_bf16.shape == x_bf16.shape and out_bf16.dtype == jnp.bfloat16
    assert bool(jnp.all(out_bf16 == ref_bf16)), "mismatch (bf16 / inplace path)"

    print("KERNEL_OK")
</pallas_src>

<mosaic_0001>
module attributes {stable_mosaic.version = 11 : i64} {
  func.func @kernel(%arg0: i32, %arg1: memref<16x4096xf32, #tpu.memory_space<vmem>>, %arg2: memref<16x4096xf32, #tpu.memory_space<vmem>>) attributes {dimension_semantics = [#tpu.dimension_semantics<parallel>], iteration_bounds = array<i64: 2>, scalar_prefetch = 0 : i64, scratch_operands = 0 : i64, tpu.core_type = #tpu.core_type<tc>, window_params = [{transform_indices = @transform_0, window_bounds = array<i64: 16, 4096>}, {transform_indices = @transform_1, window_bounds = array<i64: 16, 4096>}]} {
    %c0 = arith.constant 0 : index
    %c0_0 = arith.constant 0 : index
    %0 = vector.load %arg1[%c0, %c0_0] : memref<16x4096xf32, #tpu.memory_space<vmem>>, vector<16x4096xf32>
    %cst = arith.constant 0.000000e+00 : f32
    %1 = vector.broadcast %cst : f32 to vector<16x4096xf32>
    %2 = arith.maximumf %0, %1 : vector<16x4096xf32>
    %cst_1 = arith.constant 1.000000e+00 : f32
    %3 = vector.broadcast %cst_1 : f32 to vector<16x4096xf32>
    %4 = arith.minimumf %2, %3 : vector<16x4096xf32>
    %c0_2 = arith.constant 0 : index
    %c0_3 = arith.constant 0 : index
    %5 = vector.load %arg2[%c0_2, %c0_3] : memref<16x4096xf32, #tpu.memory_space<vmem>>, vector<16x4096xf32>
    tpu.vector_store %arg2[%c0_2, %c0_3], %4 {strides = array<i32>} : memref<16x4096xf32, #tpu.memory_space<vmem>>, vector<16x4096xf32>,
    return
  }
  func.func @transform_0(%arg0: i32) -> (i32, i32) {
    %c0_i32 = arith.constant 0 : i32
    %c0_i32_0 = arith.constant 0 : i32
    return %arg0, %c0_i32 : i32, i32
  }
  func.func @transform_1(%arg0: i32) -> (i32, i32) {
    %c0_i32 = arith.constant 0 : i32
    %c0_i32_0 = arith.constant 0 : i32
    return %arg0, %c0_i32 : i32, i32
  }
}

</mosaic_0001>

<bundles_post_ra>
// kernel: tpu_custom_call.1
= control target key start
LH: loop header
LB: loop body
LE: loop exit
PB: predicated region body
PF: predicated region fallthrough
CT: control target
= control target key end

     0   :  { %6 = vsyncpa [#allocation3], 0  ;;  %s967_s0 = inlined_call_operand.hbm [shape: f32[32,4096], index: 0, kind: input, shape index: {}]   ;;  %s968_s1 = inlined_call_operand.hbm [shape: f32[32,4096], index: 1, kind: output, shape index: {}]  }
   0x1   :  { %8 = vsyncpa [#allocation3 + $0x1], 0 }
   0x2   :  { %9 = vsyncpa [#allocation4], 0 }
   0x3   :  { %11 = vsyncpa [#allocation4 + $0x1], 0  ;;  %s666_s6 = smov 0   ;;  %s668_s7 = smov 0  }
   0x4   :  { %s670_s8 = smov 0   ;;  %s672_s9 = smov 0  }
   0x5 LB: > { %s687_s10 = sadd.s32 4294967295, %s648_s9   ;;  %s482_s11 = sadd.s32 4294967294, %s648_s9   ;;  %s648_s9 = sphi %s672_s9, %s981_s9   ;;  %s644_s8 = sphi %s670_s8, %s980_s8   ;;  %s640_s7 = sphi %s668_s7, %s979_s7   ;;  %s636_s6 = sphi %s666_s6, %s978_s6  }
   0x6   : > { %s691_s12 = sadd.s32 1, %s648_s9   ;;  %s24_s13 = sadd.s32 1, %s644_s8 }
   0x7   : > { %s21_s14 = ssub.s32 %s648_s9, %s691_s12  ;;  %p31_p0 = scmp.ne.s32.totalorder %s644_s8, %s640_s7 }
   0x8   : > { %p22_p1 = scmp.eq.s32.totalorder %s21_s14, 0  ;;  %p32_p2 = scmp.eq.s32.totalorder %s648_s9, 0 }
   0x9   : > { %p37_p3 = scmp.ne.s32.totalorder %s640_s7, %s636_s6  ;;  %p38_p4 = scmp.eq.s32.totalorder %s687_s10, 0 }
   0xa   : > { %s703_s15 = scalar_select %p22_p1, %s644_s8, %s24_s13  }
   0xb   : > { %p705_p5 = por %p32_p2, %p31_p0  ;;  %p709_p6 = por %p38_p4, %p37_p3 }
   0xc   : > { %p61_p7 = scmp.eq.s32.totalorder %s687_s10, 1  ;;  %p67_p8 = scmp.eq.s32.totalorder %s482_s11, 1 }
   0xd   : > { %p514_p10 = scmp.lt.s32.totalorder %s648_s9, 2  ;;  %s87_s20 = sand.u32 1, %s644_s8  }
   0xe   : > { %p716_p11 = por %p61_p7, %p31_p0  ;;  %p720_p12 = por %p67_p8, %p37_p3 }
   0xf   : > { %s499_s21 = sshll.u32 %s648_s9, 13  ;;  %s485_s22 = sshll.u32 %s87_s20, 9 }
  0x10   : > { %s972_s18 = scalar_select %p716_p11, 1, 0 }
  0x11   : > { %s973_s19 = scalar_select %p720_p12, 1, 0 }
  0x12   : > { %s729_s25 = scalar_lea.hbm %s967_s0, %s499_s21  ;;  %s91_s26 = scalar_lea.vmem [#allocation2], %s485_s22 }
  0x13   : > { %s99_s27 = sshll.u32 %s91_s26, 4  ;;  %p733_p13 = pnand %p514_p10, %p705_p5  ;;  %s737_s27 = int_to_ptr.vmem [resolvable:$true] %s99_s27 }
  0x14   : > { %s739_s29 = scalar_lea.sflag [#allocation3], %s87_s20  ;;  %s552_s30 = scalar_lea.hbm %s729_s25, 8192 }
  0x15   : > { %p553_p0 = scmp.ne.s32.totalorder %s729_s25, %s552_s30  ;;  %p554_p1 = pneg %p733_p13 }
  0x16   : > { %s557_s4 = scalar_lea.hbm %s967_s0, 16384  ;;  %p558_p4 = scmp.lt.u32.totalorder %s729_s25, %s967_s0 }
  0x17   : > { %p555_p2 = pnand %p554_p1, %p553_p0  ;;  %p559_p5 = scmp.lt.u32.totalorder %s557_s4, %s552_s30 }
  0x18   : > { %p561_p8 = scmp.lt.u32.totalorder %s552_s30, %s729_s25 }
  0x19   : > { %p556_p3 = pneg %p555_p2  ;;  %p560_p7 = por %p559_p5, %p558_p4 }
  0x1b   : > { %p562_p10 = por %p561_p8, %p560_p7 }
  0x1d   : > { %p563_p9 = pnand %p562_p10, %p556_p3 }
  0x1f   : > { %566 = shalt.err (!%p563_p9)
}
  0x20   : > { %s567_s13 = scalar_lea.vmem %s737_s27, 8192  ;;  %s650_s14 = smov [#allocation2]  }
  0x21   : > { %p568_p0 = scmp.ne.s32.totalorder %s737_s27, %s567_s13  ;;  %s572_s16 = sshll.u32 %s650_s14, 4  ;;  %s573_s16 = int_to_ptr.vmem [resolvable:$false] %s572_s16 }
  0x22   : > { %s574_s20 = scalar_lea.vmem %s573_s16, 16384  ;;  %p575_p11 = scmp.lt.s32.totalorder %s737_s27, %s573_s16 }
  0x23   : > { %p570_p2 = pnand %p568_p0, %p554_p1  ;;  %p576_p4 = scmp.lt.s32.totalorder %s574_s20, %s567_s13 }
  0x25   : > { %p571_p12 = pneg %p570_p2  ;;  %p577_p5 = por %p576_p4, %p575_p11 }
  0x27   : > { %p578_p7 = pnand %p577_p5, %p571_p12 }
  0x29   : > { %581 = shalt.err (!%p578_p7)
}
  0x2a   : > { %s651_s21 = smov 4096   ;;  %s652_s22 = smov 256  }
  0x2b   : > { %509 = dma.hbm_to_vmem [thread:$0]  (!%p733_p13), %s729_s25, 8192, %s737_s27, %s739_s29, %s651_s21, %s651_s21, %s652_s22  }
  0x2c   : > { %p489_p9 = scmp.ge.s32.totalorder %s648_s9, 1  ;;  %p107_p1 = scmp.lt.s32.totalorder %s648_s9, 3 }
  0x2e   : > { %p108_p3 = pnand %p489_p9, %p107_p1 }
  0x2f   : > { %s770_s23 = sand.u32 (!%p108_p3), 1, %s640_s7  }
  0x30   : > { %111 = sbr.rel (%p108_p3) target bundleno = 122 (0x7a), region = 24  ;;  %s490_s24 = sshll.u32 (!%p108_p3), %s770_s23, 9 }
  0x31   : > { %s114_s26 = scalar_lea.sflag (!%p108_p3), [#allocation3], %s770_s23  ;;  %s776_s30 = scalar_lea.vmem (!%p108_p3), [#allocation2], %s490_s24 }
  0x37   : > { %627 = dma.done.wait (%p709_p6), %s114_s26, 8192  }
  0x38   : > { %629 = vsyncadd (%p709_p6), %s114_s26, 4294959104  ;;  %v138_v0 = vld [vmem:[%s776_s30] sm:$0xff]  ;;  %v139_v1 = vld [vmem:[%s776_s30 + $0x8] sm:$0xff]  ;;  %s501_s25 = sshll.u32 %s687_s10, 13  ;;  %s798_s17 = scalar_lea.vmem [#allocation5], %s490_s24 }
  0x39   : > { %v140_v2 = vld [vmem:[%s776_s30 + $0x10] sm:$0xff]  ;;  %v202_v3 = vmax.f32 %v138_v0, 0.0  ;;  %v203_v4 = vmax.f32 %v139_v1, 0.0  ;;  %v141_v6 = vld [vmem:[%s776_s30 + $0x18] sm:$0xff]  ;;  %v142_v7 = vld [vmem:[%s776_s30 + $0x20] sm:$0xff]  ;;  %s409_s27 = sshll.u32 %s798_s17, 4  ;;  %s916_s2 = scalar_lea.hbm %s968_s1, %s501_s25  ;;  %s918_s27 = int_to_ptr.vmem [resolvable:$true] %s409_s27 }
  0x3a   : > { %v204_v5 = vmax.f32 %v140_v2, 0.0  ;;  %v143_v8 = vld [vmem:[%s776_s30 + $0x28] sm:$0xff]  ;;  %v205_v9 = vmax.f32 %v141_v6, 0.0  ;;  %v206_v10 = vmax.f32 %v142_v7, 0.0  ;;  %v144_v12 = vld [vmem:[%s776_s30 + $0x30] sm:$0xff]  ;;  %v145_v13 = vld [vmem:[%s776_s30 + $0x38] sm:$0xff] }
  0x3b   : > { %v207_v11 = vmax.f32 %v143_v8, 0.0  ;;  %v146_v14 = vld [vmem:[%s776_s30 + $0x40] sm:$0xff]  ;;  %v266_v15 = vmin.f32 %v202_v3, 1.0  ;;  %v267_v16 = vmin.f32 %v203_v4, 1.0  ;;  %v208_v18 = vmax.f32 %v144_v12, 0.0  ;;  %v147_v19 = vld [vmem:[%s776_s30 + $0x48] sm:$0xff] }
  0x3c   : > { %v268_v17 = vmin.f32 %v204_v5, 1.0  ;;  %v148_v20 = vld [vmem:[%s776_s30 + $0x50] sm:$0xff]  ;;  %v269_v21 = vmin.f32 %v205_v9, 1.0  ;;  %v270_v22 = vmin.f32 %v206_v10, 1.0  ;;  %v209_v24 = vmax.f32 %v145_v13, 0.0  ;;  %v149_v25 = vld [vmem:[%s776_s30 + $0x58] sm:$0xff] }
  0x3d   : > { %v271_v23 = vmin.f32 %v207_v11, 1.0  ;;  %v150_v26 = vld [vmem:[%s776_s30 + $0x60] sm:$0xff]  ;;  %330 = vst [vmem:[%s798_s17] sm:$0xff] %v266_v15  ;;  %331 = vst [vmem:[%s798_s17 + $0x8] sm:$0xff] %v267_v16  ;;  %v272_v27 = vmin.f32 %v208_v18, 1.0  ;;  %v210_v28 = vmax.f32 %v146_v14, 0.0  ;;  %v211_v29 = vmax.f32 %v147_v19, 0.0 }
  0x3e   : > { %332 = vst [vmem:[%s798_s17 + $0x10] sm:$0xff] %v268_v17  ;;  %v212_v30 = vmax.f32 %v148_v20, 0.0  ;;  %v151_v31 = vld [vmem:[%s776_s30 + $0x68] sm:$0xff]  ;;  %v152_v32 = vld [vmem:[%s776_s30 + $0x70] sm:$0xff]  ;;  %333 = vst [vmem:[%s798_s17 + $0x18] sm:$0xff] %v269_v21  ;;  %v273_v33 = vmin.f32 %v209_v24, 1.0 }
  0x3f   : > { %334 = vst [vmem:[%s798_s17 + $0x20] sm:$0xff] %v270_v22  ;;  %335 = vst [vmem:[%s798_s17 + $0x28] sm:$0xff] %v271_v23  ;;  %v213_v34 = vmax.f32 %v149_v25, 0.0  ;;  %v214_v35 = vmax.f32 %v150_v26, 0.0  ;;  %v215_v36 = vmax.f32 %v151_v31, 0.0  ;;  %v153_v37 = vld [vmem:[%s776_s30 + $0x78] sm:$0xff] }
  0x40   : > { %v154_v38 = vld [vmem:[%s776_s30 + $0x80] sm:$0xff]  ;;  %336 = vst [vmem:[%s798_s17 + $0x30] sm:$0xff] %v272_v27  ;;  %v274_v39 = vmin.f32 %v210_v28, 1.0  ;;  %v275_v40 = vmin.f32 %v211_v29, 1.0  ;;  %v276_v41 = vmin.f32 %v212_v30, 1.0  ;;  %v216_v42 = vmax.f32 %v152_v32, 0.0 }
  0x41   : > { %v155_v43 = vld [vmem:[%s776_s30 + $0x88] sm:$0xff]  ;;  %v156_v44 = vld [vmem:[%s776_s30 + $0x90] sm:$0xff]  ;;  %337 = vst [vmem:[%s798_s17 + $0x38] sm:$0xff] %v273_v33  ;;  %v277_v45 = vmin.f32 %v213_v34, 1.0  ;;  %v278_v46 = vmin.f32 %v214_v35, 1.0  ;;  %v279_v47 = vmin.f32 %v215_v36, 1.0 }
  0x42   : > { %v217_v48 = vmax.f32 %v153_v37, 0.0  ;;  %v157_v49 = vld [vmem:[%s776_s30 + $0x98] sm:$0xff]  ;;  %v158_v50 = vld [vmem:[%s776_s30 + $0xa0] sm:$0xff]  ;;  %338 = vst [vmem:[%s798_s17 + $0x40] sm:$0xff] %v274_v39  ;;  %339 = vst [vmem:[%s798_s17 + $0x48] sm:$0xff] %v275_v40  ;;  %v280_v51 = vmin.f32 %v216_v42, 1.0 }
  0x43   : > { %340 = vst [vmem:[%s798_s17 + $0x50] sm:$0xff] %v276_v41  ;;  %v218_v52 = vmax.f32 %v154_v38, 0.0  ;;  %v219_v53 = vmax.f32 %v155_v43, 0.0  ;;  %v220_v54 = vmax.f32 %v156_v44, 0.0  ;;  %v159_v55 = vld [vmem:[%s776_s30 + $0xa8] sm:$0xff]  ;;  %v160_v56 = vld [vmem:[%s776_s30 + $0xb0] sm:$0xff] }
  0x44   : > { %341 = vst [vmem:[%s798_s17 + $0x58] sm:$0xff] %v277_v45  ;;  %342 = vst [vmem:[%s798_s17 + $0x60] sm:$0xff] %v278_v46  ;;  %v281_v57 = vmin.f32 %v217_v48, 1.0  ;;  %v221_v58 = vmax.f32 %v157_v49, 0.0  ;;  %v222_v59 = vmax.f32 %v158_v50, 0.0  ;;  %v223_v60 = vmax.f32 %v159_v55, 0.0 }
  0x45   : > { %343 = vst [vmem:[%s798_s17 + $0x68] sm:$0xff] %v279_v47  ;;  %v161_v61 = vld [vmem:[%s776_s30 + $0xb8] sm:$0xff]  ;;  %v162_v62 = vld [vmem:[%s776_s30 + $0xc0] sm:$0xff]  ;;  %344 = vst [vmem:[%s798_s17 + $0x70] sm:$0xff] %v280_v51  ;;  %v282_v63 = vmin.f32 %v218_v52, 1.0  ;;  %v283_v0 = vmin.f32 %v219_v53, 1.0 }
  0x46   : > { %v284_v1 = vmin.f32 %v220_v54, 1.0  ;;  %v224_v2 = vmax.f32 %v160_v56, 0.0  ;;  %v163_v3 = vld [vmem:[%s776_s30 + $0xc8] sm:$0xff]  ;;  %v164_v4 = vld [vmem:[%s776_s30 + $0xd0] sm:$0xff]  ;;  %345 = vst [vmem:[%s798_s17 + $0x78] sm:$0xff] %v281_v57  ;;  %v285_v5 = vmin.f32 %v221_v58, 1.0 }
  0x47   : > { %v286_v6 = vmin.f32 %v222_v59, 1.0  ;;  %v287_v7 = vmin.f32 %v223_v60, 1.0  ;;  %v225_v8 = vmax.f32 %v161_v61, 0.0  ;;  %v165_v9 = vld [vmem:[%s776_s30 + $0xd8] sm:$0xff]  ;;  %v166_v10 = vld [vmem:[%s776_s30 + $0xe0] sm:$0xff]  ;;  %346 = vst [vmem:[%s798_s17 + $0x80] sm:$0xff] %v282_v63 }
  0x48   : > { %347 = vst [vmem:[%s798_s17 + $0x88] sm:$0xff] %v283_v0  ;;  %348 = vst [vmem:[%s798_s17 + $0x90] sm:$0xff] %v284_v1  ;;  %v288_v11 = vmin.f32 %v224_v2, 1.0  ;;  %v226_v12 = vmax.f32 %v162_v62, 0.0  ;;  %v227_v13 = vmax.f32 %v163_v3, 0.0  ;;  %v228_v14 = vmax.f32 %v164_v4, 0.0 }
  0x49   : > { %v167_v15 = vld [vmem:[%s776_s30 + $0xe8] sm:$0xff]  ;;  %v168_v16 = vld [vmem:[%s776_s30 + $0xf0] sm:$0xff]  ;;  %349 = vst [vmem:[%s798_s17 + $0x98] sm:$0xff] %v285_v5  ;;  %350 = vst [vmem:[%s798_s17 + $0xa0] sm:$0xff] %v286_v6  ;;  %v289_v17 = vmin.f32 %v225_v8, 1.0  ;;  %v229_v18 = vmax.f32 %v165_v9, 0.0 }
  0x4a   : > { %351 = vst [vmem:[%s798_s17 + $0xa8] sm:$0xff] %v287_v7  ;;  %v230_v19 = vmax.f32 %v166_v10, 0.0  ;;  %v231_v20 = vmax.f32 %v167_v15, 0.0  ;;  %v169_v21 = vld [vmem:[%s776_s30 + $0xf8] sm:$0xff]  ;;  %v170_v22 = vld [vmem:[%s776_s30 + $0x100] sm:$0xff]  ;;  %352 = vst [vmem:[%s798_s17 + $0xb0] sm:$0xff] %v288_v11 }
  0x4b   : > { %v290_v23 = vmin.f32 %v226_v12, 1.0  ;;  %v291_v24 = vmin.f32 %v227_v13, 1.0  ;;  %v292_v25 = vmin.f32 %v228_v14, 1.0  ;;  %v232_v26 = vmax.f32 %v168_v16, 0.0  ;;  %v171_v27 = vld [vmem:[%s776_s30 + $0x108] sm:$0xff]  ;;  %v172_v28 = vld [vmem:[%s776_s30 + $0x110] sm:$0xff] }
  0x4c   : > { %353 = vst [vmem:[%s798_s17 + $0xb8] sm:$0xff] %v289_v17  ;;  %v293_v29 = vmin.f32 %v229_v18, 1.0  ;;  %v294_v30 = vmin.f32 %v230_v19, 1.0  ;;  %v295_v31 = vmin.f32 %v231_v20, 1.0  ;;  %v233_v32 = vmax.f32 %v169_v21, 0.0  ;;  %v173_v33 = vld [vmem:[%s776_s30 + $0x118] sm:$0xff] }
  0x4d   : > { %v174_v34 = vld [vmem:[%s776_s30 + $0x120] sm:$0xff]  ;;  %354 = vst [vmem:[%s798_s17 + $0xc0] sm:$0xff] %v290_v23  ;;  %355 = vst [vmem:[%s798_s17 + $0xc8] sm:$0xff] %v291_v24  ;;  %v296_v35 = vmin.f32 %v232_v26, 1.0  ;;  %v234_v36 = vmax.f32 %v170_v22, 0.0  ;;  %v235_v37 = vmax.f32 %v171_v27, 0.0 }
  0x4e   : > { %356 = vst [vmem:[%s798_s17 + $0xd0] sm:$0xff] %v292_v25  ;;  %v236_v38 = vmax.f32 %v172_v28, 0.0  ;;  %v175_v39 = vld [vmem:[%s776_s30 + $0x128] sm:$0xff]  ;;  %v176_v40 = vld [vmem:[%s776_s30 + $0x130] sm:$0xff]  ;;  %357 = vst [vmem:[%s798_s17 + $0xd8] sm:$0xff] %v293_v29  ;;  %v297_v41 = vmin.f32 %v233_v32, 1.0 }
  0x4f   : > { %358 = vst [vmem:[%s798_s17 + $0xe0] sm:$0xff] %v294_v30  ;;  %359 = vst [vmem:[%s798_s17 + $0xe8] sm:$0xff] %v295_v31  ;;  %v237_v42 = vmax.f32 %v173_v33, 0.0  ;;  %v238_v43 = vmax.f32 %v174_v34, 0.0  ;;  %v239_v44 = vmax.f32 %v175_v39, 0.0  ;;  %v177_v45 = vld [vmem:[%s776_s30 + $0x138] sm:$0xff] }
  0x50   : > { %v178_v46 = vld [vmem:[%s776_s30 + $0x140] sm:$0xff]  ;;  %360 = vst [vmem:[%s798_s17 + $0xf0] sm:$0xff] %v296_v35  ;;  %v298_v47 = vmin.f32 %v234_v36, 1.0  ;;  %v299_v48 = vmin.f32 %v235_v37, 1.0  ;;  %v300_v49 = vmin.f32 %v236_v38, 1.0  ;;  %v240_v50 = vmax.f32 %v176_v40, 0.0 }
  0x51   : > { %v179_v51 = vld [vmem:[%s776_s30 + $0x148] sm:$0xff]  ;;  %v180_v52 = vld [vmem:[%s776_s30 + $0x150] sm:$0xff]  ;;  %361 = vst [vmem:[%s798_s17 + $0xf8] sm:$0xff] %v297_v41  ;;  %v301_v53 = vmin.f32 %v237_v42, 1.0  ;;  %v302_v54 = vmin.f32 %v238_v43, 1.0  ;;  %v303_v55 = vmin.f32 %v239_v44, 1.0 }
  0x52   : > { %v241_v56 = vmax.f32 %v177_v45, 0.0  ;;  %v181_v57 = vld [vmem:[%s776_s30 + $0x158] sm:$0xff]  ;;  %v182_v58 = vld [vmem:[%s776_s30 + $0x160] sm:$0xff]  ;;  %362 = vst [vmem:[%s798_s17 + $0x100] sm:$0xff] %v298_v47  ;;  %363 = vst [vmem:[%s798_s17 + $0x108] sm:$0xff] %v299_v48  ;;  %v304_v59 = vmin.f32 %v240_v50, 1.0 }
  0x53   : > { %364 = vst [vmem:[%s798_s17 + $0x110] sm:$0xff] %v300_v49  ;;  %v242_v60 = vmax.f32 %v178_v46, 0.0  ;;  %v243_v61 = vmax.f32 %v179_v51, 0.0  ;;  %v244_v62 = vmax.f32 %v180_v52, 0.0  ;;  %v183_v63 = vld [vmem:[%s776_s30 + $0x168] sm:$0xff]  ;;  %v184_v0 = vld [vmem:[%s776_s30 + $0x170] sm:$0xff] }
  0x54   : > { %365 = vst [vmem:[%s798_s17 + $0x118] sm:$0xff] %v301_v53  ;;  %366 = vst [vmem:[%s798_s17 + $0x120] sm:$0xff] %v302_v54  ;;  %v305_v1 = vmin.f32 %v241_v56, 1.0  ;;  %v245_v2 = vmax.f32 %v181_v57, 0.0  ;;  %v246_v3 = vmax.f32 %v182_v58, 0.0  ;;  %v247_v4 = vmax.f32 %v183_v63, 0.0 }
  0x55   : > { %367 = vst [vmem:[%s798_s17 + $0x128] sm:$0xff] %v303_v55  ;;  %v185_v5 = vld [vmem:[%s776_s30 + $0x178] sm:$0xff]  ;;  %v186_v6 = vld [vmem:[%s776_s30 + $0x180] sm:$0xff]  ;;  %368 = vst [vmem:[%s798_s17 + $0x130] sm:$0xff] %v304_v59  ;;  %v306_v7 = vmin.f32 %v242_v60, 1.0  ;;  %v307_v8 = vmin.f32 %v243_v61, 1.0 }
  0x56   : > { %v308_v9 = vmin.f32 %v244_v62, 1.0  ;;  %v248_v10 = vmax.f32 %v184_v0, 0.0  ;;  %v187_v11 = vld [vmem:[%s776_s30 + $0x188] sm:$0xff]  ;;  %v188_v12 = vld [vmem:[%s776_s30 + $0x190] sm:$0xff]  ;;  %369 = vst [vmem:[%s798_s17 + $0x138] sm:$0xff] %v305_v1  ;;  %v309_v13 = vmin.f32 %v245_v2, 1.0 }
  0x57   : > { %v310_v14 = vmin.f32 %v246_v3, 1.0  ;;  %v311_v15 = vmin.f32 %v247_v4, 1.0  ;;  %v249_v16 = vmax.f32 %v185_v5, 0.0  ;;  %v189_v17 = vld [vmem:[%s776_s30 + $0x198] sm:$0xff]  ;;  %v190_v18 = vld [vmem:[%s776_s30 + $0x1a0] sm:$0xff]  ;;  %370 = vst [vmem:[%s798_s17 + $0x140] sm:$0xff] %v306_v7 }
  0x58   : > { %371 = vst [vmem:[%s798_s17 + $0x148] sm:$0xff] %v307_v8  ;;  %372 = vst [vmem:[%s798_s17 + $0x150] sm:$0xff] %v308_v9  ;;  %v312_v19 = vmin.f32 %v248_v10, 1.0  ;;  %v250_v20 = vmax.f32 %v186_v6, 0.0  ;;  %v251_v21 = vmax.f32 %v187_v11, 0.0  ;;  %v252_v22 = vmax.f32 %v188_v12, 0.0 }
  0x59   : > { %v191_v23 = vld [vmem:[%s776_s30 + $0x1a8] sm:$0xff]  ;;  %v192_v24 = vld [vmem:[%s776_s30 + $0x1b0] sm:$0xff]  ;;  %373 = vst [vmem:[%s798_s17 + $0x158] sm:$0xff] %v309_v13  ;;  %374 = vst [vmem:[%s798_s17 + $0x160] sm:$0xff] %v310_v14  ;;  %v313_v25 = vmin.f32 %v249_v16, 1.0  ;;  %v253_v26 = vmax.f32 %v189_v17, 0.0 }
  0x5a   : > { %375 = vst [vmem:[%s798_s17 + $0x168] sm:$0xff] %v311_v15  ;;  %v254_v27 = vmax.f32 %v190_v18, 0.0  ;;  %v255_v28 = vmax.f32 %v191_v23, 0.0  ;;  %v193_v29 = vld [vmem:[%s776_s30 + $0x1b8] sm:$0xff]  ;;  %v194_v30 = vld [vmem:[%s776_s30 + $0x1c0] sm:$0xff]  ;;  %376 = vst [vmem:[%s798_s17 + $0x170] sm:$0xff] %v312_v19 }
  0x5b   : > { %v314_v31 = vmin.f32 %v250_v20, 1.0  ;;  %v315_v32 = vmin.f32 %v251_v21, 1.0  ;;  %v316_v33 = vmin.f32 %v252_v22, 1.0  ;;  %v256_v34 = vmax.f32 %v192_v24, 0.0  ;;  %v195_v35 = vld [vmem:[%s776_s30 + $0x1c8] sm:$0xff]  ;;  %v196_v36 = vld [vmem:[%s776_s30 + $0x1d0] sm:$0xff] }
  0x5c   : > { %377 = vst [vmem:[%s798_s17 + $0x178] sm:$0xff] %v313_v25  ;;  %v317_v37 = vmin.f32 %v253_v26, 1.0  ;;  %v318_v38 = vmin.f32 %v254_v27, 1.0  ;;  %v319_v39 = vmin.f32 %v255_v28, 1.0  ;;  %v257_v40 = vmax.f32 %v193_v29, 0.0  ;;  %v197_v41 = vld [vmem:[%s776_s30 + $0x1d8] sm:$0xff] }
  0x5d   : > { %v198_v42 = vld [vmem:[%s776_s30 + $0x1e0] sm:$0xff]  ;;  %378 = vst [vmem:[%s798_s17 + $0x180] sm:$0xff] %v314_v31  ;;  %379 = vst [vmem:[%s798_s17 + $0x188] sm:$0xff] %v315_v32  ;;  %v320_v43 = vmin.f32 %v256_v34, 1.0  ;;  %v258_v44 = vmax.f32 %v194_v30, 0.0  ;;  %v259_v45 = vmax.f32 %v195_v35, 0.0 }
  0x5e   : > { %380 = vst [vmem:[%s798_s17 + $0x190] sm:$0xff] %v316_v33  ;;  %v260_v46 = vmax.f32 %v196_v36, 0.0  ;;  %v199_v47 = vld [vmem:[%s776_s30 + $0x1e8] sm:$0xff]  ;;  %v200_v48 = vld [vmem:[%s776_s30 + $0x1f0] sm:$0xff]  ;;  %381 = vst [vmem:[%s798_s17 + $0x198] sm:$0xff] %v317_v37  ;;  %v321_v49 = vmin.f32 %v257_v40, 1.0 }
  0x5f   : > { %382 = vst [vmem:[%s798_s17 + $0x1a0] sm:$0xff] %v318_v38  ;;  %383 = vst [vmem:[%s798_s17 + $0x1a8] sm:$0xff] %v319_v39  ;;  %v261_v50 = vmax.f32 %v197_v41, 0.0  ;;  %v262_v51 = vmax.f32 %v198_v42, 0.0  ;;  %v263_v52 = vmax.f32 %v199_v47, 0.0  ;;  %v201_v53 = vld [vmem:[%s776_s30 + $0x1f8] sm:$0xff] }
  0x60   : > { %384 = vst [vmem:[%s798_s17 + $0x1b0] sm:$0xff] %v320_v43  ;;  %v322_v54 = vmin.f32 %v258_v44, 1.0  ;;  %v323_v55 = vmin.f32 %v259_v45, 1.0  ;;  %v324_v56 = vmin.f32 %v260_v46, 1.0  ;;  %v264_v57 = vmax.f32 %v200_v48, 0.0  ;;  %385 = vst [vmem:[%s798_s17 + $0x1b8] sm:$0xff] %v321_v49 }
  0x61   : > { %v325_v58 = vmin.f32 %v261_v50, 1.0  ;;  %v326_v59 = vmin.f32 %v262_v51, 1.0  ;;  %v327_v60 = vmin.f32 %v263_v52, 1.0  ;;  %v265_v61 = vmax.f32 %v201_v53, 0.0  ;;  %s395_s3 = scalar_lea.sflag [#allocation4], %s770_s23  ;;  %s582_s4 = scalar_lea.vmem %s918_s27, 8192 }
  0x62   : > { %386 = vst [vmem:[%s798_s17 + $0x1c0] sm:$0xff] %v322_v54  ;;  %387 = vst [vmem:[%s798_s17 + $0x1c8] sm:$0xff] %v323_v55  ;;  %v328_v62 = vmin.f32 %v264_v57, 1.0  ;;  %p583_p6 = scmp.ne.s32.totalorder %s918_s27, %s582_s4  ;;  %p975_p11 = scmp.ne.s32.totalorder %s972_s18, 0 }
  0x63   : > { %388 = vst [vmem:[%s798_s17 + $0x1d0] sm:$0xff] %v324_v56  ;;  %389 = vst [vmem:[%s798_s17 + $0x1d8] sm:$0xff] %v325_v58  ;;  %v329_v63 = vmin.f32 %v265_v61, 1.0  ;;  %s653_s10 = smov [#allocation5]  }
  0x64   : > { %390 = vst [vmem:[%s798_s17 + $0x1e0] sm:$0xff] %v326_v59  ;;  %391 = vst [vmem:[%s798_s17 + $0x1e8] sm:$0xff] %v327_v60  ;;  %p584_p12 = pnand %p583_p6, %p975_p11  ;;  %s586_s5 = sshll.u32 %s653_s10, 4  ;;  %s587_s5 = int_to_ptr.vmem [resolvable:$false] %s586_s5 }
  0x65   : > { %392 = vst [vmem:[%s798_s17 + $0x1f0] sm:$0xff] %v328_v62  ;;  %393 = vst [vmem:[%s798_s17 + $0x1f8] sm:$0xff] %v329_v63  ;;  %s588_s11 = scalar_lea.vmem %s587_s5, 16384  ;;  %p589_p8 = scmp.lt.s32.totalorder %s918_s27, %s587_s5 }
  0x66   : > { %p585_p13 = pneg %p584_p12  ;;  %p590_p10 = scmp.lt.s32.totalorder %s588_s11, %s582_s4 }
  0x68   : > { %p591_p0 = por %p590_p10, %p589_p8 }
  0x6a   : > { %p592_p2 = pnand %p591_p0, %p585_p13 }
  0x6c   : > { %595 = shalt.err (!%p592_p2)
}
  0x6d   : > { %s596_s13 = scalar_lea.hbm %s916_s2, 8192  ;;  %s600_s20 = scalar_lea.hbm %s968_s1, 16384 }
  0x6e   : > { %p597_p4 = scmp.ne.s32.totalorder %s916_s2, %s596_s13  ;;  %p601_p9 = scmp.lt.u32.totalorder %s916_s2, %s968_s1 }
  0x6f   : > { %p602_p1 = scmp.lt.u32.totalorder %s600_s20, %s596_s13  ;;  %p604_p6 = scmp.lt.u32.totalorder %s596_s13, %s916_s2 }
  0x70   : > { %p598_p5 = pnand %p597_p4, %p975_p11 }
  0x71   : > { %p603_p3 = por %p602_p1, %p601_p9 }
  0x72   : > { %p599_p7 = pneg %p598_p5 }
  0x73   : > { %p605_p12 = por %p604_p6, %p603_p3 }
  0x75   : > { %p606_p13 = pnand %p605_p12, %p599_p7 }
  0x77   : > { %609 = shalt.err (!%p606_p13)
}
  0x78   : > { %s654_s24 = smov 4096   ;;  %s655_s26 = smov 256  }
  0x79   : > { %504 = dma.vmem_to_hbm [thread:$0]  (%p975_p11), %s918_s27, 8192, %s916_s2, %s395_s3, %s654_s24, %s654_s24, %s655_s26  }
  0x7a PF: > { %s424_s30 = sand.u32 1, %s636_s6   ;;  %p976_p8 = scmp.ne.s32.totalorder %s973_s19, 0 }
  0x7b   : > { %p977_p10 = scmp.ge.s32.totalorder %s648_s9, 2  ;;  %s425_s25 = scalar_lea.sflag [#allocation4], %s424_s30 }
  0x7d   : > { %p511_p0 = pnand %p977_p10, %p976_p8 }
  0x7f   : > { %631 = dma.done.wait (!%p511_p0), %s425_s25, 8192  }
  0x80   : > { %633 = vsyncadd (!%p511_p0), %s425_s25, 4294959104  ;;  %p14_p2 = scmp.ge.s32.totalorder %s691_s12, 4   ;;  %s978_s6 = smov %s640_s7 }
  0x81   : > { %s979_s7 = smov %s644_s8  ;;  %s980_s8 = smov %s703_s15 }
  0x82   : > { %s981_s9 = smov %s691_s12  ;;  %16 = sbr.rel (!%p14_p2) target bundleno = 5 (0x5), region = 69 }
  0x89   :  { %430 = vsyncpa [#allocation3], 1 }
  0x8a   :  { %432 = vsyncpa [#allocation3 + $0x1], 1 }
  0x8b   :  { %433 = vsyncpa [#allocation4], 1 }
  0x8c   :  { %435 = vsyncpa [#allocation4 + $0x1], 1 }

</bundles_post_ra>
